<compile_context>
chip_gen: v7x
topology: tpu7x:2x2x1
jax: 0.10.0
libtpu: 0.0.40
codegen_flags: <defaults>
</compile_context>

<pallas_src>
import jax
import jax.numpy as jnp
from jax.experimental import pallas as pl
from jax.experimental.pallas import tpu as pltpu

_LANE = 128
_NEG_BIG = -1e30  # padded-action logit -> exp underflows to exactly 0 in f32


def _round_up(x, m):
    return (x + m - 1) // m * m


def _policy_kernel(x_ref, w1_ref, b1_ref, w2_ref, b2_ref, w3_ref, b3_ref, out_ref):
    # x: (TB, S) f32; weights bf16 stored (in, out); biases f32 (1, out)
    x = x_ref[...]

    # affine1 + relu  (bf16 MXU operands, f32 accumulate, f32 elementwise)
    h1 = jnp.dot(x.astype(jnp.bfloat16), w1_ref[...],
                 preferred_element_type=jnp.float32) + b1_ref[...]
    h1 = jnp.maximum(h1, 0.0)

    # affine2 + relu
    h2 = jnp.dot(h1.astype(jnp.bfloat16), w2_ref[...],
                 preferred_element_type=jnp.float32) + b2_ref[...]
    h2 = jnp.maximum(h2, 0.0)

    # affine3 (output padded to 128 lanes; padded lanes carry -1e30 bias)
    logits = jnp.dot(h2.astype(jnp.bfloat16), w3_ref[...],
                     preferred_element_type=jnp.float32) + b3_ref[...]

    # softmax over the (padded) action axis
    m = jnp.max(logits, axis=-1, keepdims=True)           # XLU
    e = jnp.exp(logits - m)                                # EUP
    s = jnp.sum(e, axis=-1, keepdims=True)                 # XLU
    r = pl.reciprocal(s, approx=True)                      # EUP slot, ~free
    r = r * (2.0 - s * r)                                   # one Newton step
    out_ref[...] = e * r


def policy_forward(x, params, *, tb=128):
    """x: (batch, state_space) float32. Returns (batch, action_space) probs."""
    w1, b1, w2, b2, w3, b3 = params
    B, S = x.shape
    H = w1.shape[1]
    A = w3.shape[1]
    A_pad = _round_up(A, _LANE)          # lane-dense output width

    # Batch tile: multiple of 8 sublanes, capped (VMEM-safe even on v7x 64 MiB).
    TB = min(_round_up(B, 8), max(8, tb))
    B_pad = _round_up(B, TB)
    if B_pad != B:
        x = jnp.pad(x, ((0, B_pad - B), (0, 0)))

    # bf16 weights (halves weight DMA, native MXU dtype); f32 biases.
    w1b = w1.astype(jnp.bfloat16)
    w2b = w2.astype(jnp.bfloat16)
    b1f = b1.astype(jnp.float32).reshape(1, H)
    b2f = b2.astype(jnp.float32).reshape(1, H)
    # Pad affine3 so the kernel output is lane-dense (128 wide).
    w3p = jnp.zeros((H, A_pad), jnp.bfloat16).at[:, :A].set(w3.astype(jnp.bfloat16))
    b3p = jnp.full((1, A_pad), _NEG_BIG, jnp.float32).at[:, :A].set(
        b3.astype(jnp.float32).reshape(1, A))

    grid = (B_pad // TB,)

    def invariant(shape):
        # whole-array block, same block index every grid step -> VMEM-resident
        return pl.BlockSpec(shape, lambda i: (0,) * len(shape))

    out = pl.pallas_call(
        _policy_kernel,
        out_shape=jax.ShapeDtypeStruct((B_pad, A_pad), jnp.float32),
        grid=grid,
        in_specs=[
            pl.BlockSpec((TB, S), lambda i: (i, 0)),      # x: tiled over batch
            invariant(w1b.shape), invariant(b1f.shape),
            invariant(w2b.shape), invariant(b2f.shape),
            invariant(w3p.shape), invariant(b3p.shape),
        ],
        out_specs=pl.BlockSpec((TB, A_pad), lambda i: (i, 0)),
        compiler_params=pltpu.CompilerParams(
            dimension_semantics=("parallel",)),
    )(x, w1b, b1f, w2b, b2f, w3p, b3p)

    return out[:B, :A]


def init_params(key, state_space, hidden, action_space):
    """Deterministic synthetic init (PyTorch-style uniform fan-in bounds)."""
    ks = jax.random.split(key, 6)

    def linear(kw, kb, fan_in, fan_out):
        bound = 1.0 / jnp.sqrt(fan_in)
        # stored already transposed: (in, out)
        w = jax.random.uniform(kw, (fan_in, fan_out), jnp.float32, -bound, bound)
        b = jax.random.uniform(kb, (1, fan_out), jnp.float32, -bound, bound)
        return w, b

    w1, b1 = linear(ks[0], ks[1], state_space, hidden)
    w2, b2 = linear(ks[2], ks[3], hidden, hidden)
    w3, b3 = linear(ks[4], ks[5], hidden, action_space)
    return (w1, b1, w2, b2, w3, b3)


if __name__ == "__main__":
    key = jax.random.PRNGKey(0)
    k_x, k_p = jax.random.split(key)

    # Batched call (amortizes launch/DMA overhead); still tiny shapes.
    batch, state_space, hidden, action_space = 256, 16, 128, 4
    x = jax.random.normal(k_x, (batch, state_space), jnp.float32)
    params = init_params(k_p, state_space, hidden, action_space)

    probs = jax.block_until_ready(policy_forward(x, params, tb=128))

    # Pure-JAX reference using the same bf16-matmul / f32-accumulate math.
    def ref(x, params):
        w1, b1, w2, b2, w3, b3 = params

        def mm(a, w):
            return jnp.dot(a.astype(jnp.bfloat16), w.astype(jnp.bfloat16),
                           preferred_element_type=jnp.float32)

        h1 = jnp.maximum(mm(x, w1) + b1, 0.0)
        h2 = jnp.maximum(mm(h1, w2) + b2, 0.0)
        return jax.nn.softmax(mm(h2, w3) + b3, axis=1)

    expected = ref(x, params)

    assert probs.shape == (batch, action_space)
    row_sums = jnp.sum(probs, axis=1)
    assert bool(jnp.all(jnp.abs(row_sums - 1.0) < 1e-4))
    assert bool(jnp.max(jnp.abs(probs - expected)) < 2e-3)

    print("KERNEL_OK")
</pallas_src>

<mosaic_0001>
module attributes {stable_mosaic.version = 11 : i64} {
  func.func @_policy_kernel(%arg0: i32, %arg1: memref<128x16xf32, #tpu.memory_space<vmem>>, %arg2: memref<16x128xbf16, #tpu.memory_space<vmem>>, %arg3: memref<1x128xf32, #tpu.memory_space<vmem>>, %arg4: memref<128x128xbf16, #tpu.memory_space<vmem>>, %arg5: memref<1x128xf32, #tpu.memory_space<vmem>>, %arg6: memref<128x128xbf16, #tpu.memory_space<vmem>>, %arg7: memref<1x128xf32, #tpu.memory_space<vmem>>, %arg8: memref<128x128xf32, #tpu.memory_space<vmem>>) attributes {dimension_semantics = [#tpu.dimension_semantics<parallel>], iteration_bounds = array<i64: 2>, scalar_prefetch = 0 : i64, scratch_operands = 0 : i64, tpu.core_type = #tpu.core_type<tc>, window_params = [{transform_indices = @transform_0, window_bounds = array<i64: 128, 16>}, {pipeline_mode = #tpu.pipeline_mode<synchronous>, transform_indices = @transform_1, window_bounds = array<i64: 16, 128>}, {pipeline_mode = #tpu.pipeline_mode<synchronous>, transform_indices = @transform_2, window_bounds = array<i64: 1, 128>}, {pipeline_mode = #tpu.pipeline_mode<synchronous>, transform_indices = @transform_3, window_bounds = array<i64: 128, 128>}, {pipeline_mode = #tpu.pipeline_mode<synchronous>, transform_indices = @transform_4, window_bounds = array<i64: 1, 128>}, {pipeline_mode = #tpu.pipeline_mode<synchronous>, transform_indices = @transform_5, window_bounds = array<i64: 128, 128>}, {pipeline_mode = #tpu.pipeline_mode<synchronous>, transform_indices = @transform_6, window_bounds = array<i64: 1, 128>}, {transform_indices = @transform_7, window_bounds = array<i64: 128, 128>}]} {
    %c0 = arith.constant 0 : index
    %c0_0 = arith.constant 0 : index
    %0 = vector.load %arg1[%c0, %c0_0] : memref<128x16xf32, #tpu.memory_space<vmem>>, vector<128x16xf32>
    %1 = arith.truncf %0 : vector<128x16xf32> to vector<128x16xbf16>
    %c0_1 = arith.constant 0 : index
    %c0_2 = arith.constant 0 : index
    %2 = vector.load %arg2[%c0_1, %c0_2] : memref<16x128xbf16, #tpu.memory_space<vmem>>, vector<16x128xbf16>
    %cst = arith.constant dense<0.000000e+00> : vector<128x128xf32>
    %3 = tpu.matmul %1, %2, %cst {dimension_numbers = #tpu.dot_dimension_numbers<[1], [0], [0], [1], [0, 0, 1, 1], [], []>} : vector<128x16xbf16>, vector<16x128xbf16>, vector<128x128xf32> -> vector<128x128xf32>
    %c0_3 = arith.constant 0 : index
    %c0_4 = arith.constant 0 : index
    %4 = vector.load %arg3[%c0_3, %c0_4] : memref<1x128xf32, #tpu.memory_space<vmem>>, vector<1x128xf32>
    %5 = vector.broadcast %4 : vector<1x128xf32> to vector<128x128xf32>
    %6 = arith.addf %3, %5 : vector<128x128xf32>
    %cst_5 = arith.constant 0.000000e+00 : f32
    %7 = vector.broadcast %cst_5 : f32 to vector<128x128xf32>
    %8 = arith.maximumf %6, %7 : vector<128x128xf32>
    %9 = arith.truncf %8 : vector<128x128xf32> to vector<128x128xbf16>
    %c0_6 = arith.constant 0 : index
    %c0_7 = arith.constant 0 : index
    %10 = vector.load %arg4[%c0_6, %c0_7] : memref<128x128xbf16, #tpu.memory_space<vmem>>, vector<128x128xbf16>
    %cst_8 = arith.constant dense<0.000000e+00> : vector<128x128xf32>
    %11 = tpu.matmul %9, %10, %cst_8 {dimension_numbers = #tpu.dot_dimension_numbers<[1], [0], [0], [1], [0, 0, 1, 1], [], []>} : vector<128x128xbf16>, vector<128x128xbf16>, vector<128x128xf32> -> vector<128x128xf32>
    %c0_9 = arith.constant 0 : index
    %c0_10 = arith.constant 0 : index
    %12 = vector.load %arg5[%c0_9, %c0_10] : memref<1x128xf32, #tpu.memory_space<vmem>>, vector<1x128xf32>
    %13 = vector.broadcast %12 : vector<1x128xf32> to vector<128x128xf32>
    %14 = arith.addf %11, %13 : vector<128x128xf32>
    %cst_11 = arith.constant 0.000000e+00 : f32
    %15 = vector.broadcast %cst_11 : f32 to vector<128x128xf32>
    %16 = arith.maximumf %14, %15 : vector<128x128xf32>
    %17 = arith.truncf %16 : vector<128x128xf32> to vector<128x128xbf16>
    %c0_12 = arith.constant 0 : index
    %c0_13 = arith.constant 0 : index
    %18 = vector.load %arg6[%c0_12, %c0_13] : memref<128x128xbf16, #tpu.memory_space<vmem>>, vector<128x128xbf16>
    %cst_14 = arith.constant dense<0.000000e+00> : vector<128x128xf32>
    %19 = tpu.matmul %17, %18, %cst_14 {dimension_numbers = #tpu.dot_dimension_numbers<[1], [0], [0], [1], [0, 0, 1, 1], [], []>} : vector<128x128xbf16>, vector<128x128xbf16>, vector<128x128xf32> -> vector<128x128xf32>
    %c0_15 = arith.constant 0 : index
    %c0_16 = arith.constant 0 : index
    %20 = vector.load %arg7[%c0_15, %c0_16] : memref<1x128xf32, #tpu.memory_space<vmem>>, vector<1x128xf32>
    %21 = vector.broadcast %20 : vector<1x128xf32> to vector<128x128xf32>
    %22 = arith.addf %19, %21 : vector<128x128xf32>
    %cst_17 = arith.constant dense<0xFF800000> : vector<128xf32>
    %23 = vector.multi_reduction <maximumf>, %22, %cst_17 [1] : vector<128x128xf32> to vector<128xf32>
    %24 = vector.shape_cast %23 : vector<128xf32> to vector<128x1xf32>
    %25 = vector.broadcast %24 : vector<128x1xf32> to vector<128x128xf32>
    %26 = arith.subf %22, %25 : vector<128x128xf32>
    %27 = math.exp %26 : vector<128x128xf32>
    %cst_18 = arith.constant dense<0.000000e+00> : vector<128xf32>
    %28 = vector.multi_reduction <add>, %27, %cst_18 [1] : vector<128x128xf32> to vector<128xf32>
    %29 = vector.shape_cast %28 : vector<128xf32> to vector<128x1xf32>
    %30 = tpu.reciprocal %29 {approx = true} : vector<128x1xf32> -> vector<128x1xf32>
    %31 = arith.mulf %29, %30 : vector<128x1xf32>
    %cst_19 = arith.constant 2.000000e+00 : f32
    %32 = vector.broadcast %cst_19 : f32 to vector<128x1xf32>
    %33 = arith.subf %32, %31 : vector<128x1xf32>
    %34 = arith.mulf %30, %33 : vector<128x1xf32>
    %35 = vector.broadcast %34 : vector<128x1xf32> to vector<128x128xf32>
    %36 = arith.mulf %27, %35 : vector<128x128xf32>
    %c0_20 = arith.constant 0 : index
    %c0_21 = arith.constant 0 : index
    %37 = vector.load %arg8[%c0_20, %c0_21] : memref<128x128xf32, #tpu.memory_space<vmem>>, vector<128x128xf32>
    tpu.vector_store %arg8[%c0_20, %c0_21], %36 {strides = array<i32>} : memref<128x128xf32, #tpu.memory_space<vmem>>, vector<128x128xf32>,
    return
  }
  func.func @transform_0(%arg0: i32) -> (i32, i32) {
    %c0_i32 = arith.constant 0 : i32
    %c0_i32_0 = arith.constant 0 : i32
    return %arg0, %c0_i32 : i32, i32
  }
  func.func @transform_1(%arg0: i32) -> (i32, i32) {
    %c0_i32 = arith.constant 0 : i32
    %c0_i32_0 = arith.constant 0 : i32
    %c0_i32_1 = arith.constant 0 : i32
    return %c0_i32, %c0_i32_0 : i32, i32
  }
  func.func @transform_2(%arg0: i32) -> (i32, i32) {
    %c0_i32 = arith.constant 0 : i32
    %c0_i32_0 = arith.constant 0 : i32
    %c0_i32_1 = arith.constant 0 : i32
    return %c0_i32, %c0_i32_0 : i32, i32
  }
  func.func @transform_3(%arg0: i32) -> (i32, i32) {
    %c0_i32 = arith.constant 0 : i32
    %c0_i32_0 = arith.constant 0 : i32
    %c0_i32_1 = arith.constant 0 : i32
    return %c0_i32, %c0_i32_0 : i32, i32
  }
  func.func @transform_4(%arg0: i32) -> (i32, i32) {
    %c0_i32 = arith.constant 0 : i32
    %c0_i32_0 = arith.constant 0 : i32
    %c0_i32_1 = arith.constant 0 : i32
    return %c0_i32, %c0_i32_0 : i32, i32
  }
  func.func @transform_5(%arg0: i32) -> (i32, i32) {
    %c0_i32 = arith.constant 0 : i32
    %c0_i32_0 = arith.constant 0 : i32
    %c0_i32_1 = arith.constant 0 : i32
    return %c0_i32, %c0_i32_0 : i32, i32
  }
  func.func @transform_6(%arg0: i32) -> (i32, i32) {
    %c0_i32 = arith.constant 0 : i32
    %c0_i32_0 = arith.constant 0 : i32
    %c0_i32_1 = arith.constant 0 : i32
    return %c0_i32, %c0_i32_0 : i32, i32
  }
  func.func @transform_7(%arg0: i32) -> (i32, i32) {
    %c0_i32 = arith.constant 0 : i32
    %c0_i32_0 = arith.constant 0 : i32
    return %arg0, %c0_i32 : i32, i32
  }
}

</mosaic_0001>

<bundles_post_ra>
// kernel: tpu_custom_call.1
= control target key start
LH: loop header
LB: loop body
LE: loop exit
PB: predicated region body
PF: predicated region fallthrough
CT: control target
= control target key end

     0   :  { %12 = vsyncpa [#allocation3], 0  ;;  %s1810_s0 = inlined_call_operand.vmem [shape: f32[256,16], index: 0, kind: input, shape index: {}]   ;;  %s1811_s1 = inlined_call_operand.vmem [shape: bf16[16,128], index: 1, kind: input, shape index: {}]   ;;  %s1812_s2 = inlined_call_operand.vmem [shape: f32[1,128], index: 2, kind: input, shape index: {}]   ;;  %s1813_s3 = inlined_call_operand.vmem [shape: bf16[128,128], index: 3, kind: input, shape index: {}]   ;;  %s1814_s4 = inlined_call_operand.vmem [shape: f32[1,128], index: 4, kind: input, shape index: {}]   ;;  %s1815_s5 = inlined_call_operand.vmem [shape: bf16[128,128], index: 5, kind: input, shape index: {}]   ;;  %s1816_s6 = inlined_call_operand.vmem [shape: f32[1,128], index: 6, kind: input, shape index: {}]   ;;  %s1817_s7 = inlined_call_operand.hbm [shape: f32[256,128], index: 7, kind: output, shape index: {}]  }
   0x1   :  { %14 = vsyncpa [#allocation3 + $0x1], 0  ;;  %s1503_s24 = smov 0   ;;  %s1505_s25 = smov 0  }
   0x2   :  { %s1507_s26 = smov 0   ;;  %s1509_s27 = smov 0  }
   0x3 LB: > { %s1524_s28 = sadd.s32 4294967295, %s1458_s27   ;;  %s1110_s29 = sadd.s32 4294967294, %s1458_s27   ;;  %s1458_s27 = sphi %s1509_s27, %s1823_s27   ;;  %s1454_s26 = sphi %s1507_s26, %s1822_s26   ;;  %s1450_s25 = sphi %s1505_s25, %s1821_s25   ;;  %s1446_s24 = sphi %s1503_s24, %s1820_s24  }
   0x4   : > { %s1528_s30 = sadd.s32 1, %s1458_s27   ;;  %s179_s8 = sadd.s32 1, %s1454_s26 }
   0x5   : > { %s176_s9 = ssub.s32 %s1458_s27, %s1528_s30  ;;  %p189_p0 = scmp.ne.s32.totalorder %s1454_s26, %s1450_s25 }
   0x6   : > { %p177_p1 = scmp.eq.s32.totalorder %s176_s9, 0  ;;  %p190_p2 = scmp.eq.s32.totalorder %s1524_s28, 1 }
   0x7   : > { %p195_p3 = scmp.ne.s32.totalorder %s1450_s25, %s1446_s24  ;;  %p196_p4 = scmp.eq.s32.totalorder %s1110_s29, 1 }
   0x8   : > { %s1539_s10 = scalar_select %p177_p1, %s1454_s26, %s179_s8  }
   0x9   : > { %p1541_p5 = por %p190_p2, %p189_p0  ;;  %p1545_p6 = por %p196_p4, %p195_p3 }
   0xa   : > { %p1113_p7 = scmp.ge.s32.totalorder %s1458_s27, 1  ;;  %p241_p8 = scmp.lt.s32.totalorder %s1458_s27, 3 }
   0xc   : > { %p242_p9 = pnand %p1113_p7, %p241_p8 }
   0xd   : > { %v1315_v0 = vld [vmem:[%s1811_s1] sm:$0xff] (!%p242_p9)   ;;  %s1115_s15 = sshll.u32 (!%p242_p9), %s1524_s28, 4  ;;  %v1317_v2 = vld [vmem:[%s1813_s3 + $0x8] sm:$0xff] (!%p242_p9)   ;;  %v1318_v3 = vld [vmem:[%s1813_s3 + $0x10] sm:$0xff] (!%p242_p9)   ;;  %vm320_vm0 = vcmask (!%p242_p9), 130048   ;;  %s270_s16 = sand.u32 (!%p242_p9), 1, %s1450_s25  }
   0xe   : > { %245 = sbr.rel (%p242_p9) target bundleno = 1051 (0x41b), region = 48  ;;  %p274_p10 = scmp.lt.s32.totalorder (!%p242_p9), %s1115_s15, 31  ;;  %1192 = vmatprep.subr.bf16.mxu0 (!%p242_p9), %v1315_v0  ;;  %v1316_v1 = vld [vmem:[%s1813_s3] sm:$0xff] (!%p242_p9)   ;;  %v1319_v13 = vld [vmem:[%s1813_s3 + $0x18] sm:$0xff] (!%p242_p9)   ;;  %v1321_v21 = vld [vmem:[%s1813_s3 + $0x28] sm:$0xff] (!%p242_p9)  }
   0xf   : > { %1193 = vmatpush3.bf16.msra.mxu0 (!%p242_p9), %v1315_v0  ;;  %1210 = vmatprep.subr.bf16.mxu1 (!%p242_p9), %v1316_v1  ;;  %v1320_v18 = vld [vmem:[%s1813_s3 + $0x20] sm:$0xff] (!%p242_p9)   ;;  %v1322_v31 = vld [vmem:[%s1813_s3 + $0x30] sm:$0xff] (!%p242_p9)   ;;  %v1323_v32 = vld [vmem:[%s1813_s3 + $0x38] sm:$0xff] (!%p242_p9)   ;;  %s1114_s17 = sshll.u32 (!%p242_p9), %s270_s16, 7  ;;  %s1150_s19 = sshll.u32 (!%p242_p9), %s1524_s28, 11 }
  0x10   : > { %1211 = vmatpush3.bf16.msra.mxu1 (!%p242_p9), %v1316_v1  ;;  %v1324_v33 = vld [vmem:[%s1815_s5] sm:$0xff] (!%p242_p9)   ;;  %v1325_v34 = vld [vmem:[%s1815_s5 + $0x8] sm:$0xff] (!%p242_p9)   ;;  %v1326_v35 = vld [vmem:[%s1815_s5 + $0x10] sm:$0xff] (!%p242_p9)   ;;  %s1725_s18 = scalar_lea.vmem (!%p242_p9), [#allocation2], %s1114_s17  ;;  %s1761_s29 = scalar_lea.hbm (!%p242_p9), %s1817_s7, %s1150_s19 }
  0x11   : > { %1212 = vmatprep.subr.bf16.mxu1 (!%p242_p9), %v1317_v2  ;;  %1242 = vmatprep.subr.bf16.mxu0 (!%p242_p9), %v1324_v33  ;;  %v1327_v36 = vld [vmem:[%s1815_s5 + $0x18] sm:$0xff] (!%p242_p9)   ;;  %v1328_v37 = vld [vmem:[%s1815_s5 + $0x20] sm:$0xff] (!%p242_p9)   ;;  %v1329_v38 = vld [vmem:[%s1815_s5 + $0x28] sm:$0xff] (!%p242_p9)   ;;  %s1769_s28 = scalar_lea.sflag (!%p242_p9), [#allocation3], %s270_s16  ;;  %s1460_s8 = smov (!%p242_p9), [#allocation2]  }
  0x12   : > { %v1117_v39 = vld [vmem:[%s1812_s2] ss:$0 sm:$0xff] (!%p242_p9)  ;;  %s1400_s9 = sshll.u32 (!%p242_p9), %s1460_s8, 4  ;;  %s1401_s9 = int_to_ptr.vmem [resolvable:$false] %s1400_s9 }
  0x13   : > { %s1402_s13 = scalar_lea.vmem (!%p242_p9), %s1401_s9, 4096 }
  0x14   : > { %1213 = vmatpush3.bf16.msra.mxu1 (!%p242_p9), %v1317_v2 }
  0x15   : > { %s1825_s15 = smov (!%p274_p10, %s1115_s15), 31  ;;  %1214 = vmatprep.subr.bf16.mxu1 %v1318_v3 }
  0x16   : > { %s1116_s20 = sshll.u32 %s1825_s15, 3 }
  0x17   : > { %s1564_s23 = scalar_lea.vmem %s1810_s0, %s1116_s20  ;;  %s1048_s20 = sshll.u32 %s1725_s18, 4  ;;  %s1763_s20 = int_to_ptr.vmem [resolvable:$true] %s1048_s20 }
  0x18   : > { %v281_v4 = vld [vmem:[%s1564_s23] sm:$0xff]  ;;  %v282_v5 = vld [vmem:[%s1564_s23 + $0x8] sm:$0xff]  ;;  %v283_v6 = vld [vmem:[%s1564_s23 + $0x10] sm:$0xff]  ;;  %1215 = vmatpush3.bf16.msra.mxu1 %v1318_v3  ;;  %p1403_p0 = scmp.lt.s32.totalorder %s1763_s20, %s1401_s9 }
  0x19   : > { %v297_v7 = vpack.c.bf16 %v282_v5, %v281_v4  ;;  %v284_v8 = vld [vmem:[%s1564_s23 + $0x18] sm:$0xff]  ;;  %v285_v9 = vld [vmem:[%s1564_s23 + $0x20] sm:$0xff]  ;;  %v286_v10 = vld [vmem:[%s1564_s23 + $0x28] sm:$0xff]  ;;  %1216 = vmatprep.subr.bf16.mxu1 %v1319_v13 }
  0x1a   : > { %v298_v11 = vpack.c.bf16 %v284_v8, %v283_v6  ;;  %v299_v12 = vpack.c.bf16 %v286_v10, %v285_v9  ;;  %v287_v14 = vld [vmem:[%s1564_s23 + $0x30] sm:$0xff]  ;;  %v288_v15 = vld [vmem:[%s1564_s23 + $0x38] sm:$0xff]  ;;  %v289_v16 = vld [vmem:[%s1564_s23 + $0x40] sm:$0xff] }
  0x1b   : > { %1194 = vmatprep.mubr.msk.bf16.mxu0 %vm320_vm0, %v297_v7  ;;  %v290_v17 = vld [vmem:[%s1564_s23 + $0x48] sm:$0xff]  ;;  %v300_v19 = vpack.c.bf16 %v288_v15, %v287_v14  ;;  %v291_v22 = vld [vmem:[%s1564_s23 + $0x50] sm:$0xff]  ;;  %v292_v23 = vld [vmem:[%s1564_s23 + $0x58] sm:$0xff] }
  0x1c   : > { %1195 = vmatmul.mubr.msk.bf16.vlgmr.msra.gmra.mrb[0].mxu0 %vm320_vm0, %v298_v11  ;;  %v301_v20 = vpack.c.bf16 %v290_v17, %v289_v16  ;;  %1217 = vmatpush3.bf16.msra.mxu1 %v1319_v13  ;;  %v293_v24 = vld [vmem:[%s1564_s23 + $0x60] sm:$0xff]  ;;  %v294_v25 = vld [vmem:[%s1564_s23 + $0x68] sm:$0xff]  ;;  %v302_v26 = vpack.c.bf16 %v292_v23, %v291_v22  ;;  %v295_v28 = vld [vmem:[%s1564_s23 + $0x70] sm:$0xff] }
  0x1d   : > { %1198 = vmatprep.mubr.msk.bf16.mxu0 %vm320_vm0, %v299_v12  ;;  %1218 = vmatprep.subr.bf16.mxu1 %v1320_v18  ;;  %v303_v27 = vpack.c.bf16 %v294_v25, %v293_v24  ;;  %v296_v29 = vld [vmem:[%s1564_s23 + $0x78] sm:$0xff]  ;;  %s1396_s23 = scalar_lea.vmem %s1763_s20, 2048 }
  0x1e   : > { %v304_v30 = vpack.c.bf16 %v296_v29, %v295_v28  ;;  %1243 = vmatpush3.bf16.msra.mxu0 %v1324_v33  ;;  %v1331_v33 = vld [vmem:[%s1815_s5 + $0x38] sm:$0xff]   ;;  %p1397_p11 = scmp.ne.s32.totalorder %s1763_s20, %s1396_s23  ;;  %p1404_p1 = scmp.lt.s32.totalorder %s1402_s13, %s1396_s23 }
  0x1f   : > { %1244 = vmatprep.subr.bf16.mxu0 %v1325_v34 }
  0x20   : > { %1219 = vmatpush3.bf16.msra.mxu1 %v1320_v18  ;;  %p1398_p12 = pnand %p1397_p11, %p1541_p5  ;;  %p1405_p2 = por %p1404_p1, %p1403_p0 }
  0x21   : > { %1220 = vmatprep.subr.bf16.mxu1 %v1321_v21 }
  0x22   : > { %1245 = vmatpush3.bf16.msra.mxu0 %v1325_v34  ;;  %v1127_v34 = vld [vmem:[%s1814_s4] ss:$0 sm:$0xff]  ;;  %p1399_p13 = pneg %p1398_p12 }
  0x23   : > { %1246 = vmatprep.subr.bf16.mxu0 %v1326_v35 }
  0x24   : > { %1199 = vmatmul.mubr.msk.bf16.gmra.mrb[4].mxu0 %vm320_vm0, %v300_v19  ;;  %1221 = vmatpush3.bf16.msra.mxu1 %v1321_v21  ;;  %p1406_p3 = pnand %p1405_p2, %p1399_p13 }
  0x25   : > { %1202 = vmatprep.mubr.msk.bf16.mxu0 %vm320_vm0, %v301_v20  ;;  %1222 = vmatprep.subr.bf16.mxu1 %v1322_v31 }
  0x26   : > { %1247 = vmatpush3.bf16.msra.mxu0 %v1326_v35 }
  0x27   : > { %1248 = vmatprep.subr.bf16.mxu0 %v1327_v36 }
  0x28   : > { %1223 = vmatpush3.bf16.msra.mxu1 %v1322_v31 }
  0x29   : > { %1224 = vmatprep.subr.bf16.mxu1 %v1323_v32 }
  0x2a   : > { %1249 = vmatpush3.bf16.msra.mxu0 %v1327_v36 }
  0x2b   : > { %1250 = vmatprep.subr.bf16.mxu0 %v1328_v37 }
  0x2c   : > { %1203 = vmatmul.mubr.msk.bf16.gmra.mrb[8].mxu0 %vm320_vm0, %v302_v26  ;;  %1225 = vmatpush3.bf16.msra.mxu1 %v1323_v32  ;;  %v1330_v32 = vld [vmem:[%s1815_s5 + $0x30] sm:$0xff]  }
  0x2d   : > { %1206 = vmatprep.mubr.msk.bf16.mxu0 %vm320_vm0, %v303_v27 }
  0x2e   : > { %1251 = vmatpush3.bf16.msra.mxu0 %v1328_v37 }
  0x2f   : > { %1252 = vmatprep.subr.bf16.mxu0 %v1329_v38 }
  0x32   : > { %1253 = vmatpush3.bf16.msra.mxu0 %v1329_v38 }
  0x33   : > { %1254 = vmatprep.subr.bf16.mxu0 %v1330_v32 }
  0x34   : > { %1207 = vmatmul.mubr.msk.bf16.gmra.mrb[12].mxu0 %vm320_vm0, %v304_v30 }
  0x36   : > { %1255 = vmatpush3.bf16.msra.mxu0 %v1330_v32 }
  0x37   : > { %1256 = vmatprep.subr.bf16.mxu0 %v1331_v33 }
  0x3a   : > { %1257 = vmatpush3.bf16.msra.mxu0 %v1331_v33 }
  0xef   : > { %v1196_v40 = vpop.f32.mrb[0].mxu0 }
  0xf0   : > { %v388_v41 = vadd.f32 %v1196_v40, %v1117_v39  ;;  %v379_v42 = vpop.f32.mrb[1].mxu0 }
  0xf1   : > { %v380_v43 = vadd.f32 %v1117_v39, %v379_v42  ;;  %v1197_v44 = vpop.f32.mrb[2].mxu0 }
  0xf2   : > { %v391_v45 = vadd.f32 %v1197_v44, %v1117_v39  ;;  %v382_v46 = vpop.f32.mrb[3].mxu0  ;;  %v444_v48 = vmax.f32 %v388_v41, 0.0 }
  0xf3   : > { %v383_v47 = vadd.f32 %v1117_v39, %v382_v46  ;;  %v442_v50 = vmax.f32 %v380_v43, 0.0 }
  0xf4   : > { %v445_v49 = vmax.f32 %v391_v45, 0.0 }
  0xf5   : > { %v443_v51 = vmax.f32 %v383_v47, 0.0 }
  0xf6   : > { %v459_v52 = vpack.c.bf16 %v445_v49, %v444_v48 }
  0xf7   : > { %v1200_v53 = vpop.f32.mrb[4].mxu0  ;;  %v458_v54 = vpack.c.bf16 %v443_v51, %v442_v50 }
  0xf8   : > { %v404_v55 = vadd.f32 %v1200_v53, %v1117_v39  ;;  %v395_v56 = vpop.f32.mrb[5].mxu0 }
  0xf9   : > { %v396_v57 = vadd.f32 %v1117_v39, %v395_v56  ;;  %v1201_v58 = vpop.f32.mrb[6].mxu0  ;;  %1226 = vmatprep.mubr.bf16.mxu1 %v458_v54 }
  0xfa   : > { %v448_v59 = vmax.f32 %v404_v55, 0.0  ;;  %v407_v60 = vadd.f32 %v1201_v58, %v1117_v39  ;;  %v398_v61 = vpop.f32.mrb[7].mxu0  ;;  %1227 = vmatmul.mubr.bf16.vlgmr.msra.gmra.mrb[0].mxu1 %v459_v52 }
  0xfb   : > { %v399_v62 = vadd.f32 %v1117_v39, %v398_v61  ;;  %v446_v0 = vmax.f32 %v396_v57, 0.0 }
  0xfc   : > { %v449_v63 = vmax.f32 %v407_v60, 0.0 }
  0xfd   : > { %v447_v1 = vmax.f32 %v399_v62, 0.0 }
  0xfe   : > { %v461_v2 = vpack.c.bf16 %v449_v63, %v448_v59 }
  0xff   : > { %v460_v3 = vpack.c.bf16 %v447_v1, %v446_v0  ;;  %v1204_v4 = vpop.f32.mrb[8].mxu0 }
 0x100   : > { %v420_v5 = vadd.f32 %v1204_v4, %v1117_v39  ;;  %v411_v6 = vpop.f32.mrb[9].mxu0 }
 0x101   : > { %v412_v7 = vadd.f32 %v1117_v39, %v411_v6  ;;  %v1205_v8 = vpop.f32.mrb[10].mxu0  ;;  %1230 = vmatprep.mubr.bf16.mxu1 %v460_v3 }
 0x102   : > { %v452_v9 = vmax.f32 %v420_v5, 0.0  ;;  %v423_v10 = vadd.f32 %v1205_v8, %v1117_v39  ;;  %v414_v11 = vpop.f32.mrb[11].mxu0  ;;  %1231 = vmatmul.mubr.bf16.gmra.mrb[4].mxu1 %v461_v2 }
 0x103   : > { %v415_v12 = vadd.f32 %v1117_v39, %v414_v11  ;;  %v450_v14 = vmax.f32 %v412_v7, 0.0 }
 0x104   : > { %v453_v13 = vmax.f32 %v423_v10, 0.0 }
 0x105   : > { %v451_v15 = vmax.f32 %v415_v12, 0.0 }
 0x106   : > { %v463_v16 = vpack.c.bf16 %v453_v13, %v452_v9 }
 0x107   : > { %v462_v17 = vpack.c.bf16 %v451_v15, %v450_v14  ;;  %v1208_v18 = vpop.f32.mrb[12].mxu0 }
 0x108   : > { %v436_v19 = vadd.f32 %v1208_v18, %v1117_v39  ;;  %v427_v20 = vpop.f32.mrb[13].mxu0 }
 0x109   : > { %v428_v21 = vadd.f32 %v1117_v39, %v427_v20  ;;  %v1209_v22 = vpop.f32.mrb[14].mxu0  ;;  %1234 = vmatprep.mubr.bf16.mxu1 %v462_v17 }
 0x10a   : > { %v456_v23 = vmax.f32 %v436_v19, 0.0  ;;  %v439_v24 = vadd.f32 %v1209_v22, %v1117_v39  ;;  %v430_v25 = vpop.f32.mrb[15].mxu0  ;;  %1235 = vmatmul.mubr.bf16.gmra.mrb[8].mxu1 %v463_v16 }
 0x10b   : > { %v431_v26 = vadd.f32 %v1117_v39, %v430_v25  ;;  %v454_v28 = vmax.f32 %v428_v21, 0.0 }
 0x10c   : > { %v457_v27 = vmax.f32 %v439_v24, 0.0 }
 0x10d   : > { %v455_v29 = vmax.f32 %v431_v26, 0.0 }
 0x10e   : > { %v465_v30 = vpack.c.bf16 %v457_v27, %v456_v23  ;;  %v1136_v27 = vld [vmem:[%s1816_s6] ss:$0 sm:$0xff] }
 0x10f   : > { %v464_v31 = vpack.c.bf16 %v455_v29, %v454_v28 }
 0x111   : > { %1238 = vmatprep.mubr.bf16.mxu1 %v464_v31 }
 0x112   : > { %1239 = vmatmul.mubr.bf16.gmra.mrb[12].mxu1 %v465_v30 }
 0x1cd   : > { %v1228_v35 = vpop.f32.mrb[0].mxu1 }
 0x1ce   : > { %v580_v36 = vadd.f32 %v1228_v35, %v1127_v34  ;;  %v571_v37 = vpop.f32.mrb[1].mxu1 }
 0x1cf   : > { %v572_v38 = vadd.f32 %v1127_v34, %v571_v37  ;;  %v1229_v39 = vpop.f32.mrb[2].mxu1 }
 0x1d0   : > { %v583_v40 = vadd.f32 %v1229_v39, %v1127_v34  ;;  %v574_v41 = vpop.f32.mrb[3].mxu1  ;;  %v636_v43 = vmax.f32 %v580_v36, 0.0 }
 0x1d1   : > { %v575_v42 = vadd.f32 %v1127_v34, %v574_v41  ;;  %v634_v45 = vmax.f32 %v572_v38, 0.0 }
 0x1d2   : > { %v637_v44 = vmax.f32 %v583_v40, 0.0 }
 0x1d3   : > { %v635_v46 = vmax.f32 %v575_v42, 0.0 }
 0x1d4   : > { %v651_v47 = vpack.c.bf16 %v637_v44, %v636_v43 }
 0x1d5   : > { %v650_v48 = vpack.c.bf16 %v635_v46, %v634_v45  ;;  %v1232_v49 = vpop.f32.mrb[4].mxu1 }
 0x1d6   : > { %v596_v50 = vadd.f32 %v1232_v49, %v1127_v34  ;;  %v587_v51 = vpop.f32.mrb[5].mxu1 }
 0x1d7   : > { %v588_v52 = vadd.f32 %v1127_v34, %v587_v51  ;;  %v1233_v53 = vpop.f32.mrb[6].mxu1  ;;  %1258 = vmatprep.mubr.bf16.mxu0 %v650_v48 }
 0x1d8   : > { %v599_v54 = vadd.f32 %v1233_v53, %v1127_v34  ;;  %v590_v55 = vpop.f32.mrb[7].mxu1  ;;  %1259 = vmatmul.mubr.bf16.vlgmr.msra.gmra.mrb[16].mxu0 %v651_v47  ;;  %v640_v57 = vmax.f32 %v596_v50, 0.0 }
 0x1d9   : > { %v591_v56 = vadd.f32 %v1127_v34, %v590_v55  ;;  %v638_v59 = vmax.f32 %v588_v52, 0.0 }
 0x1da   : > { %v641_v58 = vmax.f32 %v599_v54, 0.0 }
 0x1db   : > { %v639_v60 = vmax.f32 %v591_v56, 0.0 }
 0x1dc   : > { %v653_v61 = vpack.c.bf16 %v641_v58, %v640_v57 }
 0x1dd   : > { %v652_v62 = vpack.c.bf16 %v639_v60, %v638_v59  ;;  %v1236_v63 = vpop.f32.mrb[8].mxu1 }
 0x1de   : > { %v612_v0 = vadd.f32 %v1236_v63, %v1127_v34  ;;  %v603_v1 = vpop.f32.mrb[9].mxu1 }
 0x1df   : > { %v604_v2 = vadd.f32 %v1127_v34, %v603_v1  ;;  %v1237_v3 = vpop.f32.mrb[10].mxu1  ;;  %1262 = vmatprep.mubr.bf16.mxu0 %v652_v62 }
 0x1e0   : > { %v615_v4 = vadd.f32 %v1237_v3, %v1127_v34  ;;  %v606_v5 = vpop.f32.mrb[11].mxu1  ;;  %1263 = vmatmul.mubr.bf16.gmra.mrb[20].mxu0 %v653_v61  ;;  %v644_v7 = vmax.f32 %v612_v0, 0.0 }
 0x1e1   : > { %v607_v6 = vadd.f32 %v1127_v34, %v606_v5  ;;  %v642_v9 = vmax.f32 %v604_v2, 0.0 }
 0x1e2   : > { %v645_v8 = vmax.f32 %v615_v4, 0.0 }
 0x1e3   : > { %v643_v10 = vmax.f32 %v607_v6, 0.0 }
 0x1e4   : > { %v655_v11 = vpack.c.bf16 %v645_v8, %v644_v7 }
 0x1e5   : > { %v654_v12 = vpack.c.bf16 %v643_v10, %v642_v9  ;;  %v1240_v13 = vpop.f32.mrb[12].mxu1 }
 0x1e6   : > { %v628_v14 = vadd.f32 %v1240_v13, %v1127_v34  ;;  %v619_v15 = vpop.f32.mrb[13].mxu1 }
 0x1e7   : > { %v620_v16 = vadd.f32 %v1127_v34, %v619_v15  ;;  %v1241_v17 = vpop.f32.mrb[14].mxu1  ;;  %1266 = vmatprep.mubr.bf16.mxu0 %v654_v12 }
 0x1e8   : > { %v631_v18 = vadd.f32 %v1241_v17, %v1127_v34  ;;  %v622_v19 = vpop.f32.mrb[15].mxu1  ;;  %1267 = vmatmul.mubr.bf16.gmra.mrb[24].mxu0 %v655_v11  ;;  %v648_v21 = vmax.f32 %v628_v14, 0.0 }
 0x1e9   : > { %v623_v20 = vadd.f32 %v1127_v34, %v622_v19  ;;  %v646_v23 = vmax.f32 %v620_v16, 0.0 }
 0x1ea   : > { %v649_v22 = vmax.f32 %v631_v18, 0.0 }
 0x1eb   : > { %v647_v24 = vmax.f32 %v623_v20, 0.0 }
 0x1ec   : > { %v657_v25 = vpack.c.bf16 %v649_v22, %v648_v21 }
 0x1ed   : > { %v656_v26 = vpack.c.bf16 %v647_v24, %v646_v23 }
 0x1ef   : > { %1270 = vmatprep.mubr.bf16.mxu0 %v656_v26 }
 0x1f0   : > { %1271 = vmatmul.mubr.bf16.gmra.mrb[28].mxu0 %v657_v25 }
 0x2ab   : > { %v1260_v28 = vpop.f32.mrb[16].mxu0 }
 0x2ac   : > { %v772_v29 = vadd.f32 %v1260_v28, %v1136_v27  ;;  %v763_v30 = vpop.f32.mrb[17].mxu0 }
 0x2ad   : > { %v764_v31 = vadd.f32 %v1136_v27, %v763_v30  ;;  %v1261_v32 = vpop.f32.mrb[18].mxu0 }
 0x2ae   : > { %830 = vmax.xlane.f32.xlu1 %v772_v29  ;;  %v766_v33 = vpop.f32.mrb[19].mxu0  ;;  %v775_v34 = vadd.f32 %v1261_v32, %v1136_v27 }
 0x2af   : > { %826 = vmax.xlane.f32.xlu0 %v764_v31  ;;  %v767_v35 = vadd.f32 %v1136_v27, %v766_v33 }
 0x2b2   : > { %832 = vmax.xlane.f32.xlu1 %v775_v34 }
 0x2b3   : > { %v1264_v36 = vpop.f32.mrb[20].mxu0  ;;  %828 = vmax.xlane.f32.xlu0 %v767_v35 }
 0x2b4   : > { %v788_v37 = vadd.f32 %v1264_v36, %v1136_v27  ;;  %v779_v38 = vpop.f32.mrb[21].mxu0 }
 0x2b5   : > { %v1265_v39 = vpop.f32.mrb[22].mxu0  ;;  %v780_v42 = vadd.f32 %v1136_v27, %v779_v38 }
 0x2b6   : > { %v791_v40 = vadd.f32 %v1265_v39, %v1136_v27  ;;  %v782_v41 = vpop.f32.mrb[23].mxu0 }
 0x2b7   : > { %838 = vmax.xlane.f32.xlu0 %v788_v37  ;;  %v783_v43 = vadd.f32 %v1136_v27, %v782_v41 }
 0x2b8   : > { %840 = vmax.xlane.f32.xlu1 %v791_v40 }
 0x2bb   : > { %v1268_v44 = vpop.f32.mrb[24].mxu0  ;;  %834 = vmax.xlane.f32.xlu0 %v780_v42 }
 0x2bc   : > { %v1641_v45 = vadd.f32 %v1268_v44, %v1136_v27  ;;  %v795_v46 = vpop.f32.mrb[25].mxu0  ;;  %836 = vmax.xlane.f32.xlu1 %v783_v43 }
 0x2bd   : > { %v1269_v47 = vpop.f32.mrb[26].mxu0  ;;  %v1647_v50 = vadd.f32 %v1136_v27, %v795_v46 }
 0x2be   : > { %v1643_v48 = vadd.f32 %v1269_v47, %v1136_v27  ;;  %v798_v49 = vpop.f32.mrb[27].mxu0 }
 0x2bf   : > { %846 = vmax.xlane.f32.xlu0 %v1641_v45  ;;  %v1649_v51 = vadd.f32 %v1136_v27, %v798_v49 }
 0x2c0   : > { %848 = vmax.xlane.f32.xlu1 %v1643_v48 }
 0x2c3   : > { %v1272_v52 = vpop.f32.mrb[28].mxu0  ;;  %842 = vmax.xlane.f32.xlu0 %v1647_v50 }
 0x2c4   : > { %v811_v53 = vpop.f32.mrb[29].mxu0  ;;  %844 = vmax.xlane.f32.xlu1 %v1649_v51  ;;  %v1658_v58 = vadd.f32 %v1272_v52, %v1136_v27 }
 0x2c5   : > { %v1653_v54 = vadd.f32 %v1136_v27, %v811_v53  ;;  %v1273_v55 = vpop.f32.mrb[30].mxu0 }
 0x2c6   : > { %v814_v56 = vpop.f32.mrb[31].mxu0  ;;  %v1661_v59 = vadd.f32 %v1273_v55, %v1136_v27 }
 0x2c7   : > { %v1655_v57 = vadd.f32 %v1136_v27, %v814_v56  ;;  %850 = vmax.xlane.f32.xlu0 %v1653_v54 }
 0x2c9   : > { %852 = vmax.xlane.f32.xlu1 %v1655_v57 }
 0x2cb   : > { %854 = vmax.xlane.f32.xlu0 %v1658_v58 }
 0x2cd   : > { %856 = vmax.xlane.f32.xlu1 %v1661_v59 }
 0x33b   : > { %v831_v60 = vpop.xlane.xlu1 %830 }
 0x33c   : > { %v860_v61 = vsub.f32 %v772_v29, %v831_v60  ;;  %v827_v62 = vpop.xlane.xlu0 %826 }
 0x33d   : > { %v858_v63 = vsub.f32 %v764_v31, %v827_v62 }
 0x33e   : > { %v878_v0 = vmul.f32 1.442695, %v860_v61 }
 0x33f   : > { %v874_v1 = vmul.f32 1.442695, %v858_v63  ;;  %v833_v2 = vpop.xlane.xlu1 %832 }
 0x340   : > { %1332 = vpow2.f32 %v878_v0  ;;  %v861_v3 = vsub.f32 %v775_v34, %v833_v2  ;;  %v829_v4 = vpop.xlane.xlu0 %828 }
 0x341   : > { %v859_v5 = vsub.f32 %v767_v35, %v829_v4  ;;  %1334 = vpow2.f32 %v874_v1 }
 0x342   : > { %v880_v6 = vmul.f32 1.442695, %v861_v3 }
 0x343   : > { %v876_v7 = vmul.f32 1.442695, %v859_v5 }
 0x344   : > { %1336 = vpow2.f32 %v880_v6  ;;  %v839_v8 = vpop.xlane.xlu0 %838 }
 0x345   : > { %v864_v9 = vsub.f32 %v788_v37, %v839_v8  ;;  %v841_v10 = vpop.xlane.xlu1 %840  ;;  %1338 = vpow2.f32 %v876_v7 }
 0x346   : > { %v865_v11 = vsub.f32 %v791_v40, %v841_v10 }
 0x347   : > { %v886_v12 = vmul.f32 1.442695, %v864_v9 }
 0x348   : > { %v888_v13 = vmul.f32 1.442695, %v865_v11  ;;  %v835_v14 = vpop.xlane.xlu0 %834 }
 0x349   : > { %1340 = vpow2.f32 %v886_v12  ;;  %v862_v15 = vsub.f32 %v780_v42, %v835_v14  ;;  %v837_v16 = vpop.xlane.xlu1 %836 }
 0x34a   : > { %v1665_v17 = vpop.eup %1332  ;;  %v863_v18 = vsub.f32 %v783_v43, %v837_v16  ;;  %1342 = vpow2.f32 %v888_v13 }
 0x34b   : > { %v882_v19 = vmul.f32 1.442695, %v862_v15  ;;  %910 = vadd.xlane.f32.xlu0 %v1665_v17  ;;  %v1668_v22 = vpop.eup %1334 }
 0x34c   : > { %v884_v20 = vmul.f32 1.442695, %v863_v18  ;;  %v847_v21 = vpop.xlane.xlu0 %846 }
 0x34d   : > { %1344 = vpow2.f32 %v882_v19  ;;  %v868_v23 = vsub.f32 %v1641_v45, %v847_v21  ;;  %v849_v24 = vpop.xlane.xlu1 %848 }
 0x34e   : > { %v1671_v25 = vpop.eup %1336  ;;  %v869_v26 = vsub.f32 %v1643_v48, %v849_v24  ;;  %1346 = vpow2.f32 %v884_v20 }
 0x34f   : > { %v894_v27 = vmul.f32 1.442695, %v868_v23  ;;  %912 = vadd.xlane.f32.xlu1 %v1671_v25  ;;  %906 = vadd.xlane.f32.xlu0 %v1668_v22  ;;  %v1677_v32 = vpop.eup %1338 }
 0x350   : > { %v896_v28 = vmul.f32 1.442695, %v869_v26  ;;  %v843_v29 = vpop.xlane.xlu0 %842 }
 0x351   : > { %1348 = vpow2.f32 %v894_v27  ;;  %v866_v30 = vsub.f32 %v1647_v50, %v843_v29  ;;  %v845_v31 = vpop.xlane.xlu1 %844 }
 0x352   : > { %v867_v33 = vsub.f32 %v1649_v51, %v845_v31  ;;  %1350 = vpow2.f32 %v896_v28 }
 0x353   : > { %v1680_v34 = vpop.eup %1340  ;;  %v890_v35 = vmul.f32 1.442695, %v866_v30  ;;  %908 = vadd.xlane.f32.xlu1 %v1677_v32 }
 0x354   : > { %v892_v36 = vmul.f32 1.442695, %v867_v33  ;;  %918 = vadd.xlane.f32.xlu0 %v1680_v34  ;;  %v851_v37 = vpop.xlane.xlu0 %850  ;;  %v1685_v39 = vpop.eup %1342 }
 0x355   : > { %1352 = vpow2.f32 %v890_v35  ;;  %v870_v38 = vsub.f32 %v1653_v54, %v851_v37 }
 0x356   : > { %v853_v40 = vpop.xlane.xlu1 %852  ;;  %1354 = vpow2.f32 %v892_v36 }
 0x357   : > { %v1687_v41 = vpop.eup %1344  ;;  %v898_v42 = vmul.f32 1.442695, %v870_v38  ;;  %v871_v43 = vsub.f32 %v1655_v57, %v853_v40  ;;  %920 = vadd.xlane.f32.xlu1 %v1685_v39 }
 0x358   : > { %914 = vadd.xlane.f32.xlu0 %v1687_v41  ;;  %v855_v44 = vpop.xlane.xlu0 %854  ;;  %v1693_v47 = vpop.eup %1346 }
 0x359   : > { %1356 = vpow2.f32 %v898_v42  ;;  %v900_v45 = vmul.f32 1.442695, %v871_v43  ;;  %v872_v46 = vsub.f32 %v1658_v58, %v855_v44 }
 0x35a   : > { %v857_v48 = vpop.xlane.xlu1 %856 }
 0x35b   : > { %v1695_v49 = vpop.eup %1348  ;;  %1358 = vpow2.f32 %v900_v45  ;;  %v902_v50 = vmul.f32 1.442695, %v872_v46  ;;  %v873_v51 = vsub.f32 %v1661_v59, %v857_v48  ;;  %916 = vadd.xlane.f32.xlu1 %v1693_v47 }
 0x35c   : > { %926 = vadd.xlane.f32.xlu0 %v1695_v49  ;;  %v1700_v53 = vpop.eup %1350 }
 0x35d   : > { %1360 = vpow2.f32 %v902_v50  ;;  %v904_v52 = vmul.f32 1.442695, %v873_v51 }
 0x35f   : > { %v1702_v54 = vpop.eup %1352  ;;  %1362 = vpow2.f32 %v904_v52  ;;  %928 = vadd.xlane.f32.xlu1 %v1700_v53 }
 0x360   : > { %922 = vadd.xlane.f32.xlu0 %v1702_v54  ;;  %v1706_v55 = vpop.eup %1354 }
 0x363   : > { %v1708_v56 = vpop.eup %1356  ;;  %924 = vadd.xlane.f32.xlu1 %v1706_v55 }
 0x364   : > { %930 = vadd.xlane.f32.xlu0 %v1708_v56 }
 0x365   : > { %v1712_v57 = vpop.eup %1358 }
 0x367   : > { %v1714_v58 = vpop.eup %1360  ;;  %932 = vadd.xlane.f32.xlu1 %v1712_v57 }
 0x368   : > { %934 = vadd.xlane.f32.xlu0 %v1714_v58 }
 0x369   : > { %v1718_v59 = vpop.eup %1362 }
 0x36b   : > { %936 = vadd.xlane.f32.xlu1 %v1718_v59 }
 0x3d8   : > { %v911_v60 = vpop.xlane.xlu0 %910 }
 0x3d9   : > { %1364 = vrcp.f32 %v911_v60 }
 0x3dc   : > { %v913_v61 = vpop.xlane.xlu1 %912  ;;  %v907_v62 = vpop.xlane.xlu0 %906 }
 0x3dd   : > { %1366 = vrcp.f32 %v913_v61 }
 0x3de   : > { %1368 = vrcp.f32 %v907_v62 }
 0x3e0   : > { %v909_v63 = vpop.xlane.xlu1 %908 }
 0x3e1   : > { %1370 = vrcp.f32 %v909_v63  ;;  %v919_v0 = vpop.xlane.xlu0 %918 }
 0x3e2   : > { %1372 = vrcp.f32 %v919_v0 }
 0x3e3   : > { %v1365_v1 = vpop.eup %1364 }
 0x3e4   : > { %v956_v2 = vmul.f32 %v1365_v1, %v911_v60  ;;  %v921_v3 = vpop.xlane.xlu1 %920 }
 0x3e5   : > { %1374 = vrcp.f32 %v921_v3  ;;  %v915_v4 = vpop.xlane.xlu0 %914 }
 0x3e6   : > { %v972_v5 = vsub.f32 2.0, %v956_v2  ;;  %1376 = vrcp.f32 %v915_v4 }
 0x3e7   : > { %v1367_v6 = vpop.eup %1366 }
 0x3e8   : > { %v1369_v7 = vpop.eup %1368  ;;  %v988_v8 = vmul.f32 %v1365_v1, %v972_v5  ;;  %v957_v9 = vmul.f32 %v1367_v6, %v913_v61  ;;  %v917_v10 = vpop.xlane.xlu1 %916 }
 0x3e9   : > { %v954_v11 = vmul.f32 %v1369_v7, %v907_v62  ;;  %1378 = vrcp.f32 %v917_v10  ;;  %v927_v12 = vpop.xlane.xlu0 %926 }
 0x3ea   : > { %v1004_v13 = vmul.f32 %v1665_v17, %v988_v8  ;;  %v973_v14 = vsub.f32 2.0, %v957_v9  ;;  %1380 = vrcp.f32 %v927_v12 }
 0x3eb   : > { %v1371_v15 = vpop.eup %1370  ;;  %v970_v16 = vsub.f32 2.0, %v954_v11 }
 0x3ec   : > { %v1373_v18 = vpop.eup %1372  ;;  %1020 = vst [vmem:[%s1725_s18 + $0x10] sm:$0xff] %v1004_v13  ;;  %v989_v19 = vmul.f32 %v1367_v6, %v973_v14  ;;  %v955_v20 = vmul.f32 %v1371_v15, %v909_v63  ;;  %v929_v21 = vpop.xlane.xlu1 %928 }
 0x3ed   : > { %v986_v23 = vmul.f32 %v1369_v7, %v970_v16  ;;  %v960_v24 = vmul.f32 %v1373_v18, %v919_v0  ;;  %1382 = vrcp.f32 %v929_v21  ;;  %v923_v26 = vpop.xlane.xlu0 %922 }
 0x3ee   : > { %v1005_v17 = vmul.f32 %v1671_v25, %v989_v19  ;;  %v971_v27 = vsub.f32 2.0, %v955_v20  ;;  %1384 = vrcp.f32 %v923_v26 }
 0x3ef   : > { %v1375_v28 = vpop.eup %1374  ;;  %v1002_v29 = vmul.f32 %v1668_v22, %v986_v23  ;;  %v976_v30 = vsub.f32 2.0, %v960_v24 }
 0x3f0   : > { %v1377_v31 = vpop.eup %1376  ;;  %1021 = vst [vmem:[%s1725_s18 + $0x18] sm:$0xff] %v1005_v17  ;;  %v987_v33 = vmul.f32 %v1371_v15, %v971_v27  ;;  %v961_v35 = vmul.f32 %v1375_v28, %v921_v3  ;;  %v925_v36 = vpop.xlane.xlu1 %924 }
 0x3f1   : > { %1018 = vst [vmem:[%s1725_s18] sm:$0xff] %v1002_v29  ;;  %v992_v37 = vmul.f32 %v1373_v18, %v976_v30  ;;  %v958_v38 = vmul.f32 %v1377_v31, %v915_v4  ;;  %1386 = vrcp.f32 %v925_v36  ;;  %v931_v40 = vpop.xlane.xlu0 %930 }
 0x3f2   : > { %v1003_v25 = vmul.f32 %v1677_v32, %v987_v33  ;;  %v977_v42 = vsub.f32 2.0, %v961_v35  ;;  %1388 = vrcp.f32 %v931_v40 }
 0x3f3   : > { %v1379_v43 = vpop.eup %1378  ;;  %v1008_v22 = vmul.f32 %v1680_v34, %v992_v37  ;;  %v974_v44 = vsub.f32 2.0, %v958_v38 }
 0x3f4   : > { %v1381_v45 = vpop.eup %1380  ;;  %1019 = vst [vmem:[%s1725_s18 + $0x8] sm:$0xff] %v1003_v25  ;;  %v993_v46 = vmul.f32 %v1375_v28, %v977_v42  ;;  %v959_v48 = vmul.f32 %v1379_v43, %v917_v10  ;;  %v933_v50 = vpop.xlane.xlu1 %932 }
 0x3f5   : > { %1024 = vst [vmem:[%s1725_s18 + $0x30] sm:$0xff] %v1008_v22  ;;  %v990_v51 = vmul.f32 %v1377_v31, %v974_v44  ;;  %v964_v52 = vmul.f32 %v1381_v45, %v927_v12  ;;  %1390 = vrcp.f32 %v933_v50  ;;  %v935_v60 = vpop.xlane.xlu0 %934 }
 0x3f6   : > { %v1009_v32 = vmul.f32 %v1685_v39, %v993_v46  ;;  %v975_v61 = vsub.f32 2.0, %v959_v48  ;;  %1392 = vrcp.f32 %v935_v60 }
 0x3f7   : > { %v1383_v62 = vpop.eup %1382  ;;  %v1006_v34 = vmul.f32 %v1687_v41, %v990_v51  ;;  %v980_v63 = vsub.f32 2.0, %v964_v52 }
 0x3f8   : > { %v1385_v0 = vpop.eup %1384  ;;  %1025 = vst [vmem:[%s1725_s18 + $0x38] sm:$0xff] %v1009_v32  ;;  %v991_v1 = vmul.f32 %v1379_v43, %v975_v61  ;;  %v965_v2 = vmul.f32 %v1383_v62, %v929_v21  ;;  %v937_v3 = vpop.xlane.xlu1 %936 }
 0x3f9   : > { %1022 = vst [vmem:[%s1725_s18 + $0x20] sm:$0xff] %v1006_v34  ;;  %v996_v4 = vmul.f32 %v1381_v45, %v980_v63  ;;  %v962_v5 = vmul.f32 %v1385_v0, %v923_v26  ;;  %1394 = vrcp.f32 %v937_v3 }
 0x3fa   : > { %v1007_v6 = vmul.f32 %v1693_v47, %v991_v1  ;;  %v981_v39 = vsub.f32 2.0, %v965_v2 }
 0x3fb   : > { %v1387_v7 = vpop.eup %1386  ;;  %v1012_v8 = vmul.f32 %v1695_v49, %v996_v4  ;;  %v978_v41 = vsub.f32 2.0, %v962_v5 }
 0x3fc   : > { %v1389_v9 = vpop.eup %1388  ;;  %1023 = vst [vmem:[%s1725_s18 + $0x28] sm:$0xff] %v1007_v6  ;;  %v997_v10 = vmul.f32 %v1383_v62, %v981_v39  ;;  %v963_v11 = vmul.f32 %v1387_v7, %v925_v36 }
 0x3fd   : > { %1028 = vst [vmem:[%s1725_s18 + $0x50] sm:$0xff] %v1012_v8  ;;  %v994_v12 = vmul.f32 %v1385_v0, %v978_v41  ;;  %v966_v13 = vmul.f32 %v1389_v9, %v931_v40 }
 0x3fe   : > { %v1013_v14 = vmul.f32 %v1700_v53, %v997_v10  ;;  %v979_v15 = vsub.f32 2.0, %v963_v11 }
 0x3ff   : > { %v1391_v16 = vpop.eup %1390  ;;  %v1010_v47 = vmul.f32 %v1702_v54, %v994_v12  ;;  %v982_v18 = vsub.f32 2.0, %v966_v13 }
 0x400   : > { %v1393_v19 = vpop.eup %1392  ;;  %1029 = vst [vmem:[%s1725_s18 + $0x58] sm:$0xff] %v1013_v14  ;;  %v995_v49 = vmul.f32 %v1387_v7, %v979_v15  ;;  %v967_v20 = vmul.f32 %v1391_v16, %v933_v50 }
 0x401   : > { %1026 = vst [vmem:[%s1725_s18 + $0x40] sm:$0xff] %v1010_v47  ;;  %v998_v21 = vmul.f32 %v1389_v9, %v982_v18  ;;  %v968_v23 = vmul.f32 %v1393_v19, %v935_v60 }
 0x402   : > { %v1011_v24 = vmul.f32 %v1706_v55, %v995_v49  ;;  %v983_v53 = vsub.f32 2.0, %v967_v20 }
 0x403   : > { %v1395_v26 = vpop.eup %1394  ;;  %v1014_v17 = vmul.f32 %v1708_v56, %v998_v21  ;;  %v984_v54 = vsub.f32 2.0, %v968_v23 }
 0x404   : > { %1027 = vst [vmem:[%s1725_s18 + $0x48] sm:$0xff] %v1011_v24  ;;  %v999_v27 = vmul.f32 %v1391_v16, %v983_v53  ;;  %v969_v28 = vmul.f32 %v1395_v26, %v937_v3 }
 0x405   : > { %1030 = vst [vmem:[%s1725_s18 + $0x60] sm:$0xff] %v1014_v17  ;;  %v1000_v29 = vmul.f32 %v1393_v19, %v984_v54 }
 0x406   : > { %v1015_v30 = vmul.f32 %v1712_v57, %v999_v27  ;;  %v985_v31 = vsub.f32 2.0, %v969_v28 }
 0x407   : > { %v1016_v55 = vmul.f32 %v1714_v58, %v1000_v29 }
 0x408   : > { %1031 = vst [vmem:[%s1725_s18 + $0x68] sm:$0xff] %v1015_v30  ;;  %v1001_v33 = vmul.f32 %v1395_v26, %v985_v31 }
 0x409   : > { %1032 = vst [vmem:[%s1725_s18 + $0x70] sm:$0xff] %v1016_v55 }
 0x40a   : > { %v1017_v56 = vmul.f32 %v1718_v59, %v1001_v33 }
 0x40c   : > { %1033 = vst [vmem:[%s1725_s18 + $0x78] sm:$0xff] %v1017_v56 }
 0x40d   : > { %1409 = shalt.err (!%p1406_p3)
}
 0x40e   : > { %s1410_s14 = scalar_lea.hbm %s1761_s29, 2048  ;;  %s1414_s17 = scalar_lea.hbm %s1817_s7, 4096 }
 0x40f   : > { %p1411_p4 = scmp.ne.s32.totalorder %s1761_s29, %s1410_s14  ;;  %p1415_p9 = scmp.lt.u32.totalorder %s1761_s29, %s1817_s7 }
 0x410   : > { %p1416_p10 = scmp.lt.u32.totalorder %s1414_s17, %s1410_s14  ;;  %p1418_p12 = scmp.lt.u32.totalorder %s1410_s14, %s1761_s29 }
 0x411   : > { %p1412_p7 = pnand %p1411_p4, %p1541_p5 }
 0x412   : > { %p1417_p11 = por %p1416_p10, %p1415_p9 }
 0x413   : > { %p1413_p8 = pneg %p1412_p7 }
 0x414   : > { %p1419_p13 = por %p1418_p12, %p1417_p11 }
 0x416   : > { %p1420_p0 = pnand %p1419_p13, %p1413_p8 }
 0x418   : > { %1423 = shalt.err (!%p1420_p0)
}
 0x419   : > { %s1461_s21 = smov 128   ;;  %s1462_s22 = smov 8  }
 0x41a   : > { %1274 = dma.vmem_to_hbm [thread:$0]  (%p1541_p5), %s1763_s20, 2048, %s1761_s29, %s1769_s28, %s1461_s21, %s1461_s21, %s1462_s22  }
 0x41b PF: > { %p1280_p1 = scmp.ge.s32.totalorder %s1458_s27, 2  ;;  %s1063_s23 = sand.u32 1, %s1446_s24  }
 0x41c   : > { %s1064_s8 = scalar_lea.sflag [#allocation3], %s1063_s23 }
 0x41d   : > { %p1277_p2 = pnand %p1280_p1, %p1545_p6 }
 0x41f   : > { %1441 = dma.done.wait (!%p1277_p2), %s1064_s8, 2048  }
 0x420   : > { %1443 = vsyncadd (!%p1277_p2), %s1064_s8, 4294965248  ;;  %p17_p3 = scmp.ge.s32.totalorder %s1528_s30, 4   ;;  %s1820_s24 = smov %s1450_s25 }
 0x421   : > { %s1821_s25 = smov %s1454_s26  ;;  %s1822_s26 = smov %s1539_s10 }
 0x422   : > { %s1823_s27 = smov %s1528_s30  ;;  %19 = sbr.rel (!%p17_p3) target bundleno = 3 (0x3), region = 83 }
 0x429   :  { %1069 = vsyncpa [#allocation3], 1 }
 0x42a   :  { %1071 = vsyncpa [#allocation3 + $0x1], 1 }

</bundles_post_ra>
